<compile_context>
chip_gen: v6e
topology: v6e:2x2x1
jax: 0.10.0
libtpu: 0.0.40
codegen_flags: <defaults>
</compile_context>

<pallas_src>
import jax
import jax.numpy as jnp
from jax.experimental import pallas as pl
from jax.experimental.pallas import tpu as pltpu

KERNEL_SIZE = 9
STRIDE = 2


def _round_up(x, m):
    return ((x + m - 1) // m) * m


# ---------------------------------------------------------------------------
# Pass 1: tiled matmul (+bias via augmented ones column) + partial sum-of-sq.
# ---------------------------------------------------------------------------
def _matmul_ssq_kernel(patches_ref, w_ref, conv_ref, ssq_ref, acc_ref):
    kk = pl.program_id(2)

    @pl.when(kk == 0)
    def _():
        acc_ref[...] = jnp.zeros_like(acc_ref)

    # bf16 x bf16 -> f32 accumulation on the MXU.
    acc_ref[...] += jnp.dot(patches_ref[...], w_ref[...],
                            preferred_element_type=jnp.float32)

    @pl.when(kk == pl.num_programs(2) - 1)
    def _():
        conv = acc_ref[...]
        conv_ref[...] = conv
        # Tile-local sum of squares.  Broadcast partial/1024 over the (8,128)
        # block so a plain jnp.sum of the ssq output recovers the global sum.
        partial = jnp.sum(conv * conv)
        ssq_ref[...] = jnp.broadcast_to(partial * (1.0 / 1024.0),
                                        ssq_ref.shape)


# ---------------------------------------------------------------------------
# Pass 2: elementwise squash scale; global coefficient is a (1,1) SMEM scalar.
# ---------------------------------------------------------------------------
def _scale_kernel(scale_ref, x_ref, o_ref):
    o_ref[...] = x_ref[...] * scale_ref[0, 0]


# ---------------------------------------------------------------------------
# Plain-JAX glue: im2col patch extraction (patch flattened in (c, kh, kw)
# order to match PyTorch's Conv2d (O, I, KH, KW) weight layout).
# TODO(synk): stream the 81 conv taps from a space-to-depth'd activation via a
# grid axis (scalar-prefetch offsets) instead of materializing im2col patches;
# removes the ~20x HBM duplication for large inputs.
# ---------------------------------------------------------------------------
def _im2col(x, h_out, w_out):
    n, c, _, _ = x.shape
    rows = []
    for kh in range(KERNEL_SIZE):
        cols = []
        for kw in range(KERNEL_SIZE):
            cols.append(x[:, :,
                          kh:kh + STRIDE * (h_out - 1) + 1:STRIDE,
                          kw:kw + STRIDE * (w_out - 1) + 1:STRIDE])
        rows.append(jnp.stack(cols, axis=2))               # (N, C, KW, Ho, Wo)
    patches = jnp.stack(rows, axis=2)                      # (N, C, KH, KW, Ho, Wo)
    patches = jnp.transpose(patches, (0, 4, 5, 1, 2, 3))   # (N, Ho, Wo, C, KH, KW)
    return patches.reshape(n * h_out * w_out, c * KERNEL_SIZE * KERNEL_SIZE)


def primary_caps_forward(x, conv_weights, conv_biases):
    """x: (N, C_in, H, W) NCHW.
    conv_weights: (L, C_out, C_in, 9, 9), conv_biases: (L, C_out)
    returns: (N, C_out*Hout*Wout, L) — same as the PyTorch forward."""
    n, c_in, h, w = x.shape
    l, c_out = conv_biases.shape
    h_out = (h - KERNEL_SIZE) // STRIDE + 1
    w_out = (w - KERNEL_SIZE) // STRIDE + 1

    p = n * h_out * w_out
    k = c_in * KERNEL_SIZE * KERNEL_SIZE
    m = l * c_out

    # ---- build augmented, padded bf16 operands -----------------------------
    patches = _im2col(x.astype(jnp.float32), h_out, w_out)            # (P, K)
    # Ones column carries the bias; padded rows (all-zero) therefore produce
    # exactly-zero output rows and don't perturb the global squash norm.
    patches_aug = jnp.concatenate(
        [patches, jnp.ones((p, 1), jnp.float32)], axis=1)             # (P, K+1)

    # w_mat[:, li*C_out + o] = conv_weights[li, o].reshape(-1); last row = bias
    w_mat = jnp.transpose(conv_weights.reshape(l, c_out, k).astype(jnp.float32),
                          (2, 0, 1)).reshape(k, m)
    w_aug = jnp.concatenate(
        [w_mat, conv_biases.reshape(1, m).astype(jnp.float32)], axis=0)

    k_aug = k + 1
    k_pad = _round_up(k_aug, 128)          # lane-aligned contraction dim
    m_pad = _round_up(m, 128)              # lane-dense (unmasked) stores

    tp = min(256, _round_up(p, 16))
    p_pad = _round_up(p, tp)
    tm = 256 if m_pad % 256 == 0 else 128
    tk = next(c for c in (512, 384, 256, 128) if k_pad % c == 0)

    patches_pad = jnp.zeros((p_pad, k_pad), jnp.bfloat16)
    patches_pad = patches_pad.at[:p, :k_aug].set(patches_aug.astype(jnp.bfloat16))
    w_pad = jnp.zeros((k_pad, m_pad), jnp.bfloat16)
    w_pad = w_pad.at[:k_aug, :m].set(w_aug.astype(jnp.bfloat16))

    ni, nj, nk = p_pad // tp, m_pad // tm, k_pad // tk

    cost = pl.CostEstimate(
        flops=2 * p_pad * k_pad * m_pad,
        transcendentals=0,
        bytes_accessed=(p_pad * k_pad * 2 * nj + k_pad * m_pad * 2 * ni
                        + p_pad * m_pad * 4 + ni * nj * 8 * 128 * 4),
    )

    # ---- pass 1: tiled matmul + bias + partial sum-of-squares --------------
    conv, ssq = pl.pallas_call(
        _matmul_ssq_kernel,
        out_shape=(jax.ShapeDtypeStruct((p_pad, m_pad), jnp.float32),
                   jax.ShapeDtypeStruct((ni * 8, nj * 128), jnp.float32)),
        grid=(ni, nj, nk),
        in_specs=[
            pl.BlockSpec((tp, tk), lambda i, j, kk: (i, kk)),
            pl.BlockSpec((tk, tm), lambda i, j, kk: (kk, j)),
        ],
        out_specs=(
            pl.BlockSpec((tp, tm), lambda i, j, kk: (i, j)),
            pl.BlockSpec((8, 128), lambda i, j, kk: (i, j)),
        ),
        scratch_shapes=[pltpu.VMEM((tp, tm), jnp.float32)],
        compiler_params=pltpu.CompilerParams(
            dimension_semantics=("parallel", "parallel", "arbitrary")),
        cost_estimate=cost,
    )(patches_pad, w_pad)

    # ---- global squash coefficient:  v = x * ||x|| / (1 + ||x||^2) ---------
    sq = jnp.sum(ssq)                                   # exact global sum(x^2)
    scale = (jnp.sqrt(sq) / (1.0 + sq)).reshape(1, 1).astype(jnp.float32)

    # ---- pass 2: apply the scale (elementwise, scalar via SMEM) ------------
    out = pl.pallas_call(
        _scale_kernel,
        out_shape=jax.ShapeDtypeStruct((p_pad, m_pad), jnp.float32),
        grid=(ni, nj),
        in_specs=[
            pl.BlockSpec(memory_space=pltpu.MemorySpace.SMEM),
            pl.BlockSpec((tp, tm), lambda i, j: (i, j)),
        ],
        out_specs=pl.BlockSpec((tp, tm), lambda i, j: (i, j)),
        compiler_params=pltpu.CompilerParams(
            dimension_semantics=("parallel", "parallel")),
    )(scale, conv)

    # strip padding; (P, M) -> (N, Ho, Wo, L, C_out) -> (N, C_out, Ho, Wo, L)
    out = out[:p, :m].reshape(n, h_out, w_out, l, c_out)
    out = jnp.transpose(out, (0, 4, 1, 2, 3))
    return out.reshape(n, c_out * h_out * w_out, l)


def _reference_forward(x, conv_weights, conv_biases):
    """Pure-JAX f32 reference (lax conv) reproducing the PyTorch forward."""
    l = conv_weights.shape[0]
    outs = []
    for li in range(l):
        y = jax.lax.conv_general_dilated(
            x.astype(jnp.float32), conv_weights[li].astype(jnp.float32),
            window_strides=(STRIDE, STRIDE), padding="VALID",
            dimension_numbers=("NCHW", "OIHW", "NCHW"))
        y = y + conv_biases[li].astype(jnp.float32)[None, :, None, None]
        outs.append(y.reshape(y.shape[0], -1, 1))
    cat = jnp.concatenate(outs, axis=-1)
    sq = jnp.sum(cat * cat)
    return cat * (jnp.sqrt(sq) / (1.0 + sq))


if __name__ == "__main__":
    # Module config (num_capsules / num_routing_iter are unused in forward).
    batch, in_channels, spatial = 2, 4, 16
    out_channels, capsule_length = 8, 4

    key = jax.random.PRNGKey(0)
    kx, kw, kb = jax.random.split(key, 3)
    x = jax.random.normal(kx, (batch, in_channels, spatial, spatial),
                          dtype=jnp.float32)
    fan_in = in_channels * KERNEL_SIZE * KERNEL_SIZE
    conv_weights = jax.random.normal(
        kw, (capsule_length, out_channels, in_channels, KERNEL_SIZE, KERNEL_SIZE),
        dtype=jnp.float32) * (1.0 / jnp.sqrt(fan_in))
    conv_biases = jax.random.normal(
        kb, (capsule_length, out_channels), dtype=jnp.float32) * 0.1

    out = jax.block_until_ready(
        primary_caps_forward(x, conv_weights, conv_biases))
    ref = jax.block_until_ready(
        _reference_forward(x, conv_weights, conv_biases))

    h_out = (spatial - KERNEL_SIZE) // STRIDE + 1
    assert out.shape == ref.shape == (batch,
                                      out_channels * h_out * h_out,
                                      capsule_length)
    # bf16 MXU operands (f32 accumulation) -> slightly looser tolerance.
    assert jnp.allclose(out, ref, rtol=3e-2, atol=2e-3), \
        float(jnp.max(jnp.abs(out - ref)))

    print("KERNEL_OK")
</pallas_src>

<mosaic_0001>
module attributes {stable_mosaic.version = 11 : i64} {
  func.func @_matmul_ssq_kernel(%arg0: i32, %arg1: i32, %arg2: i32, %arg3: memref<32x384xbf16, #tpu.memory_space<vmem>>, %arg4: memref<384x128xbf16, #tpu.memory_space<vmem>>, %arg5: memref<32x128xf32, #tpu.memory_space<vmem>>, %arg6: memref<8x128xf32, #tpu.memory_space<vmem>>, %arg7: memref<32x128xf32, #tpu.memory_space<vmem>>) attributes {dimension_semantics = [#tpu.dimension_semantics<parallel>, #tpu.dimension_semantics<parallel>, #tpu.dimension_semantics<arbitrary>], iteration_bounds = array<i64: 1, 1, 1>, scalar_prefetch = 0 : i64, scratch_operands = 1 : i64, tpu.core_type = #tpu.core_type<tc>, window_params = [{transform_indices = @transform_0, window_bounds = array<i64: 32, 384>}, {transform_indices = @transform_1, window_bounds = array<i64: 384, 128>}, {transform_indices = @transform_2, window_bounds = array<i64: 32, 128>}, {transform_indices = @transform_3, window_bounds = array<i64: 8, 128>}]} {
    %c0_i32 = arith.constant 0 : i32
    %0 = arith.cmpi eq, %arg2, %c0_i32 : i32
    %1 = arith.extui %0 : i1 to i32
    %c0_i32_0 = arith.constant 0 : i32
    %2 = arith.cmpi ne, %1, %c0_i32_0 : i32
    scf.if %2 {
      %cst_10 = arith.constant 0.000000e+00 : f32
      %12 = vector.broadcast %cst_10 : f32 to vector<32x128xf32>
      %c0_11 = arith.constant 0 : index
      %c0_12 = arith.constant 0 : index
      %13 = vector.load %arg7[%c0_11, %c0_12] : memref<32x128xf32, #tpu.memory_space<vmem>>, vector<32x128xf32>
      tpu.vector_store %arg7[%c0_11, %c0_12], %12 {strides = array<i32>} : memref<32x128xf32, #tpu.memory_space<vmem>>, vector<32x128xf32>,
    } else {
    }
    %c0 = arith.constant 0 : index
    %c0_1 = arith.constant 0 : index
    %3 = vector.load %arg7[%c0, %c0_1] : memref<32x128xf32, #tpu.memory_space<vmem>>, vector<32x128xf32>
    %c0_2 = arith.constant 0 : index
    %c0_3 = arith.constant 0 : index
    %4 = vector.load %arg3[%c0_2, %c0_3] : memref<32x384xbf16, #tpu.memory_space<vmem>>, vector<32x384xbf16>
    %c0_4 = arith.constant 0 : index
    %c0_5 = arith.constant 0 : index
    %5 = vector.load %arg4[%c0_4, %c0_5] : memref<384x128xbf16, #tpu.memory_space<vmem>>, vector<384x128xbf16>
    %cst = arith.constant dense<0.000000e+00> : vector<32x128xf32>
    %6 = tpu.matmul %4, %5, %cst {dimension_numbers = #tpu.dot_dimension_numbers<[1], [0], [0], [1], [0, 0, 1, 1], [], []>} : vector<32x384xbf16>, vector<384x128xbf16>, vector<32x128xf32> -> vector<32x128xf32>
    %7 = arith.addf %3, %6 : vector<32x128xf32>
    %c0_6 = arith.constant 0 : index
    %c0_7 = arith.constant 0 : index
    %8 = vector.load %arg7[%c0_6, %c0_7] : memref<32x128xf32, #tpu.memory_space<vmem>>, vector<32x128xf32>
    tpu.vector_store %arg7[%c0_6, %c0_7], %7 {strides = array<i32>} : memref<32x128xf32, #tpu.memory_space<vmem>>, vector<32x128xf32>,
    %c0_i32_8 = arith.constant 0 : i32
    %9 = arith.cmpi eq, %arg2, %c0_i32_8 : i32
    %10 = arith.extui %9 : i1 to i32
    %c0_i32_9 = arith.constant 0 : i32
    %11 = arith.cmpi ne, %10, %c0_i32_9 : i32
    scf.if %11 {
      %c0_10 = arith.constant 0 : index
      %c0_11 = arith.constant 0 : index
      %12 = vector.load %arg7[%c0_10, %c0_11] : memref<32x128xf32, #tpu.memory_space<vmem>>, vector<32x128xf32>
      %c0_12 = arith.constant 0 : index
      %c0_13 = arith.constant 0 : index
      %13 = vector.load %arg5[%c0_12, %c0_13] : memref<32x128xf32, #tpu.memory_space<vmem>>, vector<32x128xf32>
      tpu.vector_store %arg5[%c0_12, %c0_13], %12 {strides = array<i32>} : memref<32x128xf32, #tpu.memory_space<vmem>>, vector<32x128xf32>,
      %14 = arith.mulf %12, %12 : vector<32x128xf32>
      %15 = vector.shape_cast %14 : vector<32x128xf32> to vector<1x32x128xf32>
      %cst_14 = arith.constant dense<0.000000e+00> : vector<1xf32>
      %16 = vector.multi_reduction <add>, %15, %cst_14 [1, 2] : vector<1x32x128xf32> to vector<1xf32>
      %17 = vector.shape_cast %16 : vector<1xf32> to vector<1x1x1xf32>
      %18 = vector.extract %17[0, 0, 0] : f32 from vector<1x1x1xf32>
      %cst_15 = arith.constant 9.765625E-4 : f32
      %19 = arith.mulf %18, %cst_15 : f32
      %20 = vector.broadcast %19 : f32 to vector<8x128xf32>
      %c0_16 = arith.constant 0 : index
      %c0_17 = arith.constant 0 : index
      %21 = vector.load %arg6[%c0_16, %c0_17] : memref<8x128xf32, #tpu.memory_space<vmem>>, vector<8x128xf32>
      tpu.vector_store %arg6[%c0_16, %c0_17], %20 {strides = array<i32>} : memref<8x128xf32, #tpu.memory_space<vmem>>, vector<8x128xf32>,
    } else {
    }
    return
  }
  func.func @transform_0(%arg0: i32, %arg1: i32, %arg2: i32) -> (i32, i32) {
    %c0_i32 = arith.constant 0 : i32
    return %arg0, %arg2 : i32, i32
  }
  func.func @transform_1(%arg0: i32, %arg1: i32, %arg2: i32) -> (i32, i32) {
    %c0_i32 = arith.constant 0 : i32
    return %arg2, %arg1 : i32, i32
  }
  func.func @transform_2(%arg0: i32, %arg1: i32, %arg2: i32) -> (i32, i32) {
    %c0_i32 = arith.constant 0 : i32
    return %arg0, %arg1 : i32, i32
  }
  func.func @transform_3(%arg0: i32, %arg1: i32, %arg2: i32) -> (i32, i32) {
    %c0_i32 = arith.constant 0 : i32
    return %arg0, %arg1 : i32, i32
  }
}

</mosaic_0001>

<bundles_post_ra>
// kernel: tpu_custom_call.1
= control target key start
LH: loop header
LB: loop body
LE: loop exit
PB: predicated region body
PF: predicated region fallthrough
CT: control target
= control target key end

     0   :  { %9 = vsyncpa [#allocation4], 0  ;;  %s718_s0 = inlined_call_operand.hbm [shape: bf16[32,384], index: 0, kind: input, shape index: {}]   ;;  %s719_s1 = inlined_call_operand.hbm [shape: bf16[384,128], index: 1, kind: input, shape index: {}]   ;;  %s720_s2 = inlined_call_operand.hbm [shape: f32[32,128], index: 2, kind: output, shape index: {0}]   ;;  %s721_s3 = inlined_call_operand.hbm [shape: f32[8,128], index: 3, kind: output, shape index: {1}]  }
   0x1   :  { %10 = vsyncpa [#allocation7], 0 }
   0x2   :  { %11 = vsyncpa [#allocation5], 0 }
   0x3   :  { %12 = vsyncpa [#allocation10], 0  ;;  %s676_s12 = smov [#allocation3]  }
   0x4   :  { %s18_s13 = sshll.u32 %s676_s12, 4  ;;  %s19_s13 = int_to_ptr.vmem [resolvable:$true] %s18_s13 }
   0x5   :  { %s596_s14 = scalar_lea.vmem %s19_s13, 768  ;;  %p601_p1 = scmp.lt.s32.totalorder %s19_s13, %s19_s13 }
   0x6   :  { %p597_p0 = scmp.ne.s32.totalorder %s19_s13, %s596_s14  ;;  %p602_p2 = scmp.lt.s32.totalorder %s596_s14, %s596_s14 }
   0x8   :  { %p603_p3 = por %p602_p2, %p601_p1 }
   0xa   :  { %p604_p4 = pnand %p603_p3, %p597_p0 }
   0xc   :  { %607 = shalt.err (!%p604_p4)
}
   0xd   :  { %s677_s15 = smov 192   ;;  %s678_s16 = smov 12  }
   0xe   :  { %24 = dma.hbm_to_vmem [thread:$0]  %s718_s0, 768, %s19_s13, [#allocation4], %s677_s15, %s677_s15, %s678_s16  }
   0xf   :  { %s679_s19 = smov [#allocation6]  }
  0x10   :  { %s30_s20 = sshll.u32 %s679_s19, 4  ;;  %s31_s20 = int_to_ptr.vmem [resolvable:$true] %s30_s20 }
  0x11   :  { %s616_s21 = scalar_lea.vmem %s31_s20, 3072  ;;  %p621_p6 = scmp.lt.s32.totalorder %s31_s20, %s31_s20 }
  0x12   :  { %p617_p5 = scmp.ne.s32.totalorder %s31_s20, %s616_s21  ;;  %p622_p7 = scmp.lt.s32.totalorder %s616_s21, %s616_s21 }
  0x14   :  { %p623_p8 = por %p622_p7, %p621_p6 }
  0x16   :  { %p624_p9 = pnand %p623_p8, %p617_p5 }
  0x18   :  { %627 = shalt.err (!%p624_p9)
}
  0x19   :  { %s680_s22 = smov 64   ;;  %s681_s23 = smov 4  }
  0x1a   :  { %36 = dma.hbm_to_vmem [thread:$0]  %s719_s1, 3072, %s31_s20, [#allocation7], %s680_s22, %s680_s22, %s681_s23  }
  0x1b   :  { %668 = dma.done.wait [#allocation4], 768  }
  0x1c   :  { %669 = vsyncadd [#allocation4], 4294966528 }
  0x1d   :  { %670 = dma.done.wait [#allocation7], 3072  }
  0x1e   :  { %671 = vsyncadd [#allocation7], 4294964224  ;;  %v556_v0 = vld [vmem:[#allocation6 + $0x78] sm:$0xff]   ;;  %v559_v3 = vld [vmem:[#allocation6 + $0x70] sm:$0xff]   ;;  %s682_s0 = smov [#allocation8]  }
  0x1f   :  { %v557_v1 = vld [vmem:[#allocation6 + $0xb8] sm:$0xff]   ;;  %486 = vmatprep.subr.bf16.mxu0 %v556_v0  ;;  %v560_v4 = vld [vmem:[#allocation6 + $0xb0] sm:$0xff]   ;;  %v562_v6 = vld [vmem:[#allocation6 + $0x68] sm:$0xff]   ;;  %s429_s1 = sshll.u32 %s682_s0, 4  ;;  %s430_s1 = int_to_ptr.vmem [resolvable:$true] %s429_s1 }
  0x20   :  { %v558_v2 = vld [vmem:[#allocation6 + $0x38] sm:$0xff]   ;;  %524 = vmatprep.subr.bf16.mxu1 %v557_v1  ;;  %v561_v5 = vld [vmem:[#allocation6 + $0x30] sm:$0xff]   ;;  %v563_v7 = vld [vmem:[#allocation6 + $0xa8] sm:$0xff]   ;;  %s628_s26 = scalar_lea.vmem %s430_s1, 512  ;;  %p633_p11 = scmp.lt.s32.totalorder %s430_s1, %s430_s1 }
  0x21   :  { %487 = vmatpush3.bf16.msra.mxu0 %v558_v2  ;;  %525 = vmatpush3.bf16.msra.mxu1 %v557_v1  ;;  %v564_v8 = vld [vmem:[#allocation6 + $0x28] sm:$0xff]   ;;  %v565_v9 = vld [vmem:[#allocation6 + $0x60] sm:$0xff]   ;;  %v568_v12 = vld [vmem:[#allocation6 + $0x58] sm:$0xff]   ;;  %p629_p10 = scmp.ne.s32.totalorder %s430_s1, %s628_s26  ;;  %p634_p12 = scmp.lt.s32.totalorder %s628_s26, %s628_s26 }
  0x22   :  { %488 = vmatprep.subr.bf16.mxu0 %v559_v3  ;;  %526 = vmatprep.subr.bf16.mxu1 %v560_v4  ;;  %v566_v10 = vld [vmem:[#allocation6 + $0xa0] sm:$0xff]   ;;  %v569_v13 = vld [vmem:[#allocation6 + $0x98] sm:$0xff]   ;;  %v571_v15 = vld [vmem:[#allocation6 + $0x50] sm:$0xff]  }
  0x23   :  { %v567_v11 = vld [vmem:[#allocation6 + $0x20] sm:$0xff]   ;;  %v570_v14 = vld [vmem:[#allocation6 + $0x18] sm:$0xff]   ;;  %v572_v16 = vld [vmem:[#allocation6 + $0x90] sm:$0xff]   ;;  %p635_p13 = por %p634_p12, %p633_p11 }
  0x24   :  { %v573_v17 = vld [vmem:[#allocation6 + $0x10] sm:$0xff]   ;;  %v574_v18 = vld [vmem:[#allocation6 + $0x48] sm:$0xff]   ;;  %v577_v21 = vld [vmem:[#allocation6 + $0x40] sm:$0xff]  }
  0x25   :  { %489 = vmatpush3.bf16.msra.mxu0 %v561_v5  ;;  %527 = vmatpush3.bf16.msra.mxu1 %v560_v4  ;;  %v575_v19 = vld [vmem:[#allocation6 + $0x88] sm:$0xff]   ;;  %v578_v22 = vld [vmem:[#allocation6 + $0x80] sm:$0xff]   ;;  %v580_v26 = vld [vmem:[#allocation3] ss:$12 sps:$4 sm:$0xff]   ;;  %p636_p0 = pnand %p635_p13, %p629_p10 }
  0x26   :  { %490 = vmatprep.subr.bf16.mxu0 %v562_v6  ;;  %528 = vmatprep.subr.bf16.mxu1 %v563_v7  ;;  %v576_v20 = vld [vmem:[#allocation6 + $0x8] sm:$0xff]   ;;  %v582_v23 = vld [vmem:[#allocation3 + $0x4] ss:$12 sps:$4 sm:$0xff]   ;;  %v583_v24 = vld [vmem:[#allocation3 + $0x8] ss:$12 sps:$4 sm:$0xff]  }
  0x27   :  { %320 = vmatprep.mubr.bf16.mxu0 %v582_v23  ;;  %v579_v25 = vld [vmem:[#allocation6] sm:$0xff]   ;;  %540 = vmatprep.mubr.bf16.mxu1 %v583_v24  ;;  %v584_v27 = vld [vmem:[#allocation3 + $0x20] ss:$12 sps:$4 sm:$0xff]   ;;  %v585_v28 = vld [vmem:[#allocation3 + $0x1c] ss:$12 sps:$4 sm:$0xff]  }
  0x28   :  { %v587_v29 = vld [vmem:[#allocation3 + $0x18] ss:$12 sps:$4 sm:$0xff]  }
  0x29   :  { %491 = vmatpush3.bf16.msra.mxu0 %v564_v8  ;;  %529 = vmatpush3.bf16.msra.mxu1 %v563_v7 }
  0x2a   :  { %492 = vmatprep.subr.bf16.mxu0 %v565_v9  ;;  %530 = vmatprep.subr.bf16.mxu1 %v566_v10 }
  0x2d   :  { %493 = vmatpush3.bf16.msra.mxu0 %v567_v11  ;;  %531 = vmatpush3.bf16.msra.mxu1 %v566_v10 }
  0x2e   :  { %494 = vmatprep.subr.bf16.mxu0 %v568_v12  ;;  %532 = vmatprep.subr.bf16.mxu1 %v569_v13 }
  0x31   :  { %495 = vmatpush3.bf16.msra.mxu0 %v570_v14  ;;  %533 = vmatpush3.bf16.msra.mxu1 %v569_v13 }
  0x32   :  { %496 = vmatprep.subr.bf16.mxu0 %v571_v15  ;;  %534 = vmatprep.subr.bf16.mxu1 %v572_v16 }
  0x35   :  { %497 = vmatpush3.bf16.msra.mxu0 %v573_v17  ;;  %535 = vmatpush3.bf16.msra.mxu1 %v572_v16 }
  0x36   :  { %498 = vmatprep.subr.bf16.mxu0 %v574_v18  ;;  %536 = vmatprep.subr.bf16.mxu1 %v575_v19 }
  0x39   :  { %499 = vmatpush3.bf16.msra.mxu0 %v576_v20  ;;  %537 = vmatpush3.bf16.msra.mxu1 %v575_v19 }
  0x3a   :  { %500 = vmatprep.subr.bf16.mxu0 %v577_v21  ;;  %538 = vmatprep.subr.bf16.mxu1 %v578_v22 }
  0x3d   :  { %501 = vmatpush3.bf16.msra.mxu0 %v579_v25  ;;  %539 = vmatpush3.bf16.msra.mxu1 %v578_v22 }
  0x40   :  { %321 = vmatmul.mubr.bf16.vlgmr.msra.gmra.mxu0 %v580_v26  ;;  %541 = vmatmul.mubr.bf16.vlgmr.msra.gmra.mxu1 %v584_v27 }
  0x41   :  { %328 = vmatprep.mubr.bf16.mxu0 %v585_v28 }
  0x48   :  { %329 = vmatmul.mubr.bf16.gmra.mxu0 %v587_v29 }
 0x100   :  { %v502_v30 = vpop.f32.mrf.mxu0  ;;  %v542_v31 = vpop.f32.mrf.mxu1 }
 0x102   :  { %v503_v32 = vpop.f32.mrf.mxu0  ;;  %v371_v33 = vpop.f32.mrf.mxu1 }
 0x103   :  { %v504_v34 = vadd.f32 %v503_v32, %v502_v30 }
 0x104   :  { %v505_v35 = vpop.f32.mrf.mxu0  ;;  %v543_v36 = vpop.f32.mrf.mxu1 }
 0x105   :  { %v372_v37 = vadd.f32 %v504_v34, %v371_v33 }
 0x106   :  { %v506_v38 = vpop.f32.mrf.mxu0  ;;  %v374_v40 = vpop.f32.mrf.mxu1 }
 0x107   :  { %401 = vst [vmem:[#allocation8] sm:$0xff] %v372_v37  ;;  %v507_v39 = vadd.f32 %v506_v38, %v505_v35  ;;  %v405_v49 = vmul.f32 %v372_v37, %v372_v37 }
 0x108   :  { %v508_v41 = vpop.f32.mrf.mxu0 }
 0x109   :  { %v375_v42 = vadd.f32 %v507_v39, %v374_v40 }
 0x10a   :  { %v509_v43 = vpop.f32.mrf.mxu0 }
 0x10b   :  { %402 = vst [vmem:[#allocation8 + $0x8] sm:$0xff] %v375_v42  ;;  %v510_v44 = vadd.f32 %v509_v43, %v508_v41  ;;  %v406_v46 = vmul.f32 %v375_v42, %v375_v42 }
 0x10c   :  { %v511_v45 = vpop.f32.mrf.mxu0 }
 0x10d   :  { %v380_v47 = vadd.f32 %v542_v31, %v510_v44  ;;  %v409_v53 = vadd.f32 %v406_v46, %v405_v49 }
 0x10e   :  { %v512_v48 = vpop.f32.mrf.mxu0 }
 0x10f   :  { %403 = vst [vmem:[#allocation8 + $0x10] sm:$0xff] %v380_v47  ;;  %v513_v50 = vadd.f32 %v512_v48, %v511_v45  ;;  %v407_v51 = vmul.f32 %v380_v47, %v380_v47 }
 0x111   :  { %v383_v52 = vadd.f32 %v543_v36, %v513_v50  ;;  %v410_v55 = vadd.f32 %v409_v53, %v407_v51 }
 0x113   :  { %404 = vst [vmem:[#allocation8 + $0x18] sm:$0xff] %v383_v52  ;;  %v408_v54 = vmul.f32 %v383_v52, %v383_v52 }
 0x115   :  { %v411_v56 = vadd.f32 %v410_v55, %v408_v54 }
 0x117   :  { %412 = vadd.xlane.f32.xlu0 %v411_v56 }
 0x118   :  { %639 = shalt.err (!%p636_p0)
}
 0x119   :  { %s683_s27 = smov 128   ;;  %s684_s28 = smov 8  }
 0x11a   :  { %435 = dma.vmem_to_hbm [thread:$0]  %s430_s1, 512, %s720_s2, [#allocation5], %s683_s27, %s683_s27, %s684_s28  }
 0x11b   :  { %s685_s4 = smov [#allocation9]  }
 0x11c   :  { %s442_s5 = sshll.u32 %s685_s4, 4  ;;  %s443_s5 = int_to_ptr.vmem [resolvable:$true] %s442_s5 }
 0x11d   :  { %s648_s8 = scalar_lea.vmem %s443_s5, 128  ;;  %p653_p2 = scmp.lt.s32.totalorder %s443_s5, %s443_s5 }
 0x11e   :  { %p649_p1 = scmp.ne.s32.totalorder %s443_s5, %s648_s8  ;;  %p654_p3 = scmp.lt.s32.totalorder %s648_s8, %s648_s8 }
 0x120   :  { %p655_p4 = por %p654_p3, %p653_p2 }
 0x122   :  { %p656_p5 = pnand %p655_p4, %p649_p1 }
 0x1a0   :  { %v413_v57 = vpop.xlane.xlu0 %412 }
 0x1a1   :  { %v414_v58 = vrot.slane %v413_v57, 4 }
 0x1a3   :  { %v415_v59 = vadd.f32 %v414_v58, %v413_v57 }
 0x1a5   :  { %v416_v60 = vrot.slane %v415_v59, 2 }
 0x1a7   :  { %v417_v61 = vadd.f32 %v416_v60, %v415_v59 }
 0x1a9   :  { %v418_v62 = vrot.slane %v417_v61, 1 }
 0x1ab   :  { %v419_v63 = vadd.f32 %v418_v62, %v417_v61 }
 0x1ad   :  { %544 = vpush %v419_v63 }
 0x1de   :  { %s545_s6 = spop %544 }
 0x1df   :  { %s421_s7 = smul.f32 0.0009765625, %s545_s6 }
 0x1e1   :  { %v422_v0 = vstv %s421_s7 }
 0x1e2   :  { %423 = vst [vmem:[#allocation9] sm:$0xff] %v422_v0 }
 0x1e3   :  { %659 = shalt.err (!%p656_p5)
}
 0x1e4   :  { %445 = dma.vmem_to_hbm [thread:$0]  %s443_s5, 128, %s721_s3, [#allocation10]  }
 0x1e5   :  { %672 = dma.done.wait [#allocation5], 512  }
 0x1e6   :  { %673 = vsyncadd [#allocation5], 4294966784 }
 0x1e7   :  { %674 = dma.done.wait [#allocation10], 128  }
 0x1e8   :  { %675 = vsyncadd [#allocation10], 4294967168 }
 0x1e9   :  { %452 = vsyncpa [#allocation4], 1 }
 0x1ea   :  { %453 = vsyncpa [#allocation7], 1 }
 0x1eb   :  { %454 = vsyncpa [#allocation5], 1 }
 0x1ec   :  { %455 = vsyncpa [#allocation10], 1 }

</bundles_post_ra>
